<compile_context>
chip_gen: v7x
topology: tpu7x:2x2x1
jax: 0.10.0
libtpu: 0.0.40
codegen_flags: <defaults>
</compile_context>

<pallas_src>
import functools

import jax
import jax.numpy as jnp
from jax.experimental import pallas as pl
from jax.experimental.pallas import tpu as pltpu


H_PAD = 128          # hidden / feature lane padding (vreg lane width)
_BIAS_ROWS = 8       # one sublane group holding all bias / projection vectors


def _round_up(x, m):
    return (x + m - 1) // m * m


# ---------------------------------------------------------------------------
# Kernel
# ---------------------------------------------------------------------------
def _dvn_kernel(a_ref, x_ref, gidx_ref, w_ref, bias_ref, out_ref,
                *, nq, nt, k, h_pad, n_pad, r_pad):
    f32 = jnp.float32
    bf16 = jnp.bfloat16
    h = h_pad

    # --- coalesced weights (single input DMA), static tile-aligned lane slices ---
    w1 = w_ref[:, 0 * h:1 * h]            # GCN layer 1                 [h, h]  bf16
    w2 = w_ref[:, 1 * h:2 * h]            # GCN layer 2                 [h, h]
    wa = w_ref[:, 2 * h:4 * h]            # [Wp1u | Wv1q]               [h, 2h]
    wb = w_ref[:, 4 * h:6 * h]            # [Wp1v | Wv1t]               [h, 2h]

    bias = bias_ref[...]                   # [8, h] f32 (single input DMA)
    b1, b2 = bias[0:1], bias[1:2]
    bp1, bv1 = bias[2:3], bias[3:4]
    wp2_row, wv2_row = bias[4:5], bias[5:6]
    bp2 = bias[6:7, 0:1]
    bv2 = bias[6:7, 1:2]

    a = a_ref[...]                         # block-diag normalized adjacency [n, n] bf16
    x = x_ref[...]                         # stacked (query | target) features [n, h] bf16

    # --- shared 2-layer GCN over BOTH graphs at once (block-diagonal A) ---
    ax = jnp.dot(a, x, preferred_element_type=f32).astype(bf16)
    h1 = jnp.maximum(jnp.dot(ax, w1, preferred_element_type=f32) + b1, 0.0).astype(bf16)
    ah1 = jnp.dot(a, h1, preferred_element_type=f32).astype(bf16)
    h2 = jnp.maximum(jnp.dot(ah1, w2, preferred_element_type=f32) + b2, 0.0).astype(bf16)

    # --- ONE fused MXU op gathers h_v (rows 0..k-1), h_u (row k) and both graph
    #     mean-pools (rows k+1, k+2).  Selector built on the VPU from the int32
    #     indices, so its construction overlaps with the encoder matmuls. ---
    col = jax.lax.broadcasted_iota(jnp.int32, (r_pad, n_pad), 1)
    row = jax.lax.broadcasted_iota(jnp.int32, (r_pad, n_pad), 0)
    sel = (col == gidx_ref[...]).astype(f32)                           # one-hot gathers
    sel = sel + jnp.where((row == k + 1) & (col < nq), 1.0 / nq, 0.0)  # mean over query
    sel = sel + jnp.where((row == k + 2) & (col >= nq) & (col < nq + nt),
                          1.0 / nt, 0.0)                               # mean over target
    g = jnp.dot(sel.astype(bf16), h2, preferred_element_type=f32).astype(bf16)  # [r_pad, h]

    # --- policy + value first layers as two wide matmuls (concat-split weights) ---
    u_mat = jnp.dot(g, wa, preferred_element_type=f32)                # [r_pad, 2h]
    v_mat = jnp.dot(g, wb, preferred_element_type=f32)                # [r_pad, 2h]

    # policy hidden (valid on rows 0..k-1): relu(h_v @ Wp1v + h_u @ Wp1u + bp1)
    hid_pol = jnp.maximum(v_mat[:, 0:h] + u_mat[k:k + 1, 0:h] + bp1, 0.0)        # [r_pad, h]
    # value hidden (one row): relu(mean_q @ Wv1q + mean_t @ Wv1t + bv1)
    hid_val = jnp.maximum(u_mat[k + 1:k + 2, h:2 * h] + v_mat[k + 2:k + 3, h:2 * h] + bv1,
                          0.0)                                                    # [1, h]

    # --- fused final width-1 projections: ONE VPU multiply + ONE XLU lane-reduce
    #     + ONE full-tile store (no zero-init, no masked partial stores). ---
    ridx = jax.lax.broadcasted_iota(jnp.int32, (r_pad, 1), 0)
    is_pol = ridx < k
    hid = jnp.where(is_pol, hid_pol, hid_val)                         # [r_pad, h]
    proj = jnp.where(is_pol, wp2_row, wv2_row)                        # [r_pad, h]
    bcol = jnp.where(is_pol, bp2, jnp.where(ridx == k, bv2, 0.0))     # [r_pad, 1]
    raw = jnp.sum(hid * proj, axis=-1, keepdims=True) + bcol          # [r_pad, 1]
    # rows 0..k-1 = policy, row k = value, rest = 0
    out_ref[...] = jnp.where(ridx <= k, raw, 0.0)


# ---------------------------------------------------------------------------
# Host-side packing / wrappers (plain-JAX glue)
# ---------------------------------------------------------------------------
def pack_dvn_params(params):
    """Pack all weights into one bf16 array and all bias/projection rows into one
    f32 array (done once per model, not per forward call)."""
    h = params["w2"].shape[1]
    d = params["w1"].shape[0]
    assert d <= H_PAD and h <= H_PAD

    def pad_w(w):
        out = jnp.zeros((H_PAD, H_PAD), jnp.float32)
        return out.at[: w.shape[0], : w.shape[1]].set(w)

    wbig = jnp.concatenate(
        [pad_w(params["w1"]), pad_w(params["w2"]),
         pad_w(params["wp1u"]), pad_w(params["wv1q"]),
         pad_w(params["wp1v"]), pad_w(params["wv1t"])], axis=1,
    ).astype(jnp.bfloat16)                                   # [128, 6*128]

    bias = jnp.zeros((_BIAS_ROWS, H_PAD), jnp.float32)
    bias = bias.at[0, :h].set(params["b1"][0])
    bias = bias.at[1, :h].set(params["b2"][0])
    bias = bias.at[2, :h].set(params["bp1"][0])
    bias = bias.at[3, :h].set(params["bv1"][0])
    bias = bias.at[4, :h].set(params["wp2"][:, 0])
    bias = bias.at[5, :h].set(params["wv2"][:, 0])
    bias = bias.at[6, 0].set(params["bp2"][0, 0])
    bias = bias.at[6, 1].set(params["bv2"][0, 0])
    return wbig, bias


def dvn_forward_batched(xq_b, xt_b, aq_b, at_b, wbig, bias, u_b, vli_b):
    """Batched DVN forward.  B independent (u, v_li) states; grid axis is
    'parallel' so v7x's second TensorCore is used when B >= 2."""
    b_sz, nq, d = xq_b.shape
    nt = xt_b.shape[1]
    k = vli_b.shape[1]
    n = nq + nt
    n_pad = _round_up(n, 128)
    r_pad = _round_up(k + 3, 8)

    # block-diagonal normalized adjacency (both graphs encoded in one pass)
    a = jnp.zeros((b_sz, n_pad, n_pad), jnp.float32)
    a = a.at[:, :nq, :nq].set(aq_b).at[:, nq:n, nq:n].set(at_b)
    a = a.astype(jnp.bfloat16)

    # stacked node features, zero-padded to 128 lanes
    x = jnp.zeros((b_sz, n_pad, H_PAD), jnp.float32)
    x = x.at[:, :nq, :d].set(xq_b).at[:, nq:n, :d].set(xt_b)
    x = x.astype(jnp.bfloat16)

    # gather indices: rows 0..k-1 -> target candidates, row k -> query node u,
    # rows k+1.. -> sentinel -1 (mean rows are built statically in-kernel)
    gidx = jnp.full((b_sz, r_pad, 1), -1, jnp.int32)
    gidx = gidx.at[:, :k, 0].set(nq + vli_b.astype(jnp.int32))
    gidx = gidx.at[:, k, 0].set(u_b.astype(jnp.int32))

    kernel = functools.partial(_dvn_kernel, nq=nq, nt=nt, k=k,
                               h_pad=H_PAD, n_pad=n_pad, r_pad=r_pad)

    out = pl.pallas_call(
        kernel,
        out_shape=jax.ShapeDtypeStruct((b_sz, r_pad, 1), jnp.float32),
        grid=(b_sz,),
        in_specs=[
            pl.BlockSpec((None, n_pad, n_pad), lambda b: (b, 0, 0)),   # A (per instance)
            pl.BlockSpec((None, n_pad, H_PAD), lambda b: (b, 0, 0)),   # X (per instance)
            pl.BlockSpec((None, r_pad, 1), lambda b: (b, 0, 0)),       # gather indices
            pl.BlockSpec((H_PAD, 6 * H_PAD), lambda b: (0, 0)),        # packed weights
            pl.BlockSpec((_BIAS_ROWS, H_PAD), lambda b: (0, 0)),       # packed biases
        ],
        out_specs=pl.BlockSpec((None, r_pad, 1), lambda b: (b, 0, 0)),
        compiler_params=pltpu.CompilerParams(
            dimension_semantics=("parallel",)),
    )(a, x, gidx, wbig, bias)

    return out[:, :k, 0], out[:, k, 0]


def dvn_wrapper_forward(xq, xt, aq, at, params, u, v_li):
    """Pallas-backed DVN_wrapper.forward -> (out_policy [K], out_value scalar)."""
    wbig, bias = pack_dvn_params(params)
    pol, val = dvn_forward_batched(
        xq[None], xt[None], aq[None], at[None], wbig, bias,
        jnp.asarray([u], jnp.int32), jnp.asarray(v_li, jnp.int32)[None])
    return pol[0], val[0]


# ---------------------------------------------------------------------------
# References
# ---------------------------------------------------------------------------
def _reference_forward_f32(xq, xt, aq, at, p, u, v_li):
    """Original full-f32 semantics."""
    def encode(a, x):
        h1 = jnp.maximum(a @ x @ p["w1"] + p["b1"], 0.0)
        return jnp.maximum(a @ h1 @ p["w2"] + p["b2"], 0.0)

    hq, ht = encode(aq, xq), encode(at, xt)
    hu, hv = hq[u][None, :], ht[v_li]
    ph = jnp.maximum(hu @ p["wp1u"] + hv @ p["wp1v"] + p["bp1"], 0.0)
    pol = ph @ p["wp2"] + p["bp2"]
    mq, mt = hq.mean(0, keepdims=True), ht.mean(0, keepdims=True)
    zh = jnp.maximum(mq @ p["wv1q"] + mt @ p["wv1t"] + p["bv1"], 0.0)
    val = zh @ p["wv2"] + p["bv2"]
    return pol[:, 0], val[0, 0]


def _reference_forward_bf16(xq, xt, aq, at, p, u, v_li):
    """Same math with the kernel's dtype schedule (bf16 MXU operands, f32 acc),
    but structured completely differently (per-graph, direct indexing)."""
    f32, bf16 = jnp.float32, jnp.bfloat16
    mm = lambda a, b: jnp.dot(a.astype(bf16), b.astype(bf16), preferred_element_type=f32)

    def encode(a, x):
        h1 = jnp.maximum(mm(mm(a, x), p["w1"]) + p["b1"], 0.0)
        h2 = jnp.maximum(mm(mm(a, h1), p["w2"]) + p["b2"], 0.0)
        return h2.astype(bf16).astype(f32)     # kernel rounds H2 to bf16 before gather/pool

    hq, ht = encode(aq, xq), encode(at, xt)
    hu, hv = hq[u][None, :], ht[v_li]
    mq, mt = hq.mean(0, keepdims=True), ht.mean(0, keepdims=True)
    ph = jnp.maximum(mm(hu, p["wp1u"]) + mm(hv, p["wp1v"]) + p["bp1"], 0.0)
    pol = jnp.sum(ph * p["wp2"][:, 0][None, :], axis=-1) + p["bp2"][0, 0]
    zh = jnp.maximum(mm(mq, p["wv1q"]) + mm(mt, p["wv1t"]) + p["bv1"], 0.0)
    val = jnp.sum(zh * p["wv2"][:, 0][None, :], axis=-1)[0] + p["bv2"][0, 0]
    return pol, val


# ---------------------------------------------------------------------------
# Demo / test harness
# ---------------------------------------------------------------------------
def _init_params(key, d_in, hidden):
    names_shapes = [
        ("w1", (d_in, hidden)), ("b1", (1, hidden)),
        ("w2", (hidden, hidden)), ("b2", (1, hidden)),
        ("wp1u", (hidden, hidden)), ("wp1v", (hidden, hidden)), ("bp1", (1, hidden)),
        ("wp2", (hidden, 1)), ("bp2", (1, 1)),
        ("wv1q", (hidden, hidden)), ("wv1t", (hidden, hidden)), ("bv1", (1, hidden)),
        ("wv2", (hidden, 1)), ("bv2", (1, 1)),
    ]
    keys = jax.random.split(key, len(names_shapes))
    return {
        name: (0.1 * jax.random.normal(k, shape, dtype=jnp.float32))
        for (name, shape), k in zip(names_shapes, keys)
    }


def _norm_adj(key, n):
    a = (jax.random.uniform(key, (n, n)) < 0.3).astype(jnp.float32)
    a = jnp.maximum(a, a.T) + jnp.eye(n, dtype=jnp.float32)
    deg = a.sum(axis=1, keepdims=True)
    return a / deg


if __name__ == "__main__":
    key = jax.random.PRNGKey(0)
    k_xq, k_xt, k_aq, k_at, k_p = jax.random.split(key, 5)

    NQ, NT, D_IN, HIDDEN, K = 8, 16, 16, 32, 8     # small synthetic graph sizes

    xq = jax.random.normal(k_xq, (NQ, D_IN), dtype=jnp.float32)
    xt = jax.random.normal(k_xt, (NT, D_IN), dtype=jnp.float32)
    aq = _norm_adj(k_aq, NQ)
    at = _norm_adj(k_at, NT)
    params = _init_params(k_p, D_IN, HIDDEN)

    u = 3                                           # current query node
    v_li = jnp.arange(K, dtype=jnp.int32)           # candidate target nodes

    # ---- single-instance forward (B = 1) ----
    out_policy, out_value = dvn_wrapper_forward(xq, xt, aq, at, params, u, v_li)
    jax.block_until_ready((out_policy, out_value))
    assert out_policy.shape == (K,)

    ref_pol, ref_val = _reference_forward_bf16(xq, xt, aq, at, params, u, v_li)
    assert jnp.allclose(out_policy, ref_pol, atol=2e-3, rtol=2e-3)
    assert jnp.allclose(out_value, ref_val, atol=2e-3, rtol=2e-3)

    f32_pol, f32_val = _reference_forward_f32(xq, xt, aq, at, params, u, v_li)
    assert jnp.allclose(out_policy, f32_pol, atol=5e-2, rtol=5e-2)
    assert jnp.allclose(out_value, f32_val, atol=5e-2, rtol=5e-2)

    # ---- batched forward (B = 2): exercises the parallel grid / 2nd TC on v7x ----
    wbig, bias = pack_dvn_params(params)
    u_b = jnp.asarray([3, 5], jnp.int32)
    v_b = jnp.stack([v_li, jnp.flip(v_li)])
    pol_b, val_b = dvn_forward_batched(
        jnp.stack([xq, xq]), jnp.stack([xt, xt]),
        jnp.stack([aq, aq]), jnp.stack([at, at]),
        wbig, bias, u_b, v_b)
    jax.block_until_ready((pol_b, val_b))
    for i in range(2):
        rp, rv = _reference_forward_bf16(xq, xt, aq, at, params, int(u_b[i]), v_b[i])
        assert jnp.allclose(pol_b[i], rp, atol=2e-3, rtol=2e-3)
        assert jnp.allclose(val_b[i], rv, atol=2e-3, rtol=2e-3)

    # TODO(synk): FLAGS.time_analysis / OurTimer logging, encoder cache reset and the
    # unused u2v_li / nn_map / graph_filter / query_tree args are host-side
    # bookkeeping with no device compute; intentionally not modeled.
    print("KERNEL_OK")
</pallas_src>

<mosaic_0001>
module attributes {stable_mosaic.version = 11 : i64} {
  func.func @_dvn_kernel(%arg0: i32, %arg1: memref<1x128x128xbf16, #tpu.memory_space<vmem>>, %arg2: memref<1x128x128xbf16, #tpu.memory_space<vmem>>, %arg3: memref<1x16x1xi32, #tpu.memory_space<vmem>>, %arg4: memref<128x768xbf16, #tpu.memory_space<vmem>>, %arg5: memref<8x128xf32, #tpu.memory_space<vmem>>, %arg6: memref<1x16x1xf32, #tpu.memory_space<vmem>>) attributes {dimension_semantics = [#tpu.dimension_semantics<parallel>], iteration_bounds = array<i64: 1>, scalar_prefetch = 0 : i64, scratch_operands = 0 : i64, tpu.core_type = #tpu.core_type<tc>, window_params = [{transform_indices = @transform_0, window_bounds = array<i64: 1, 128, 128>}, {transform_indices = @transform_1, window_bounds = array<i64: 1, 128, 128>}, {transform_indices = @transform_2, window_bounds = array<i64: 1, 16, 1>}, {pipeline_mode = #tpu.pipeline_mode<synchronous>, transform_indices = @transform_3, window_bounds = array<i64: 128, 768>}, {pipeline_mode = #tpu.pipeline_mode<synchronous>, transform_indices = @transform_4, window_bounds = array<i64: 8, 128>}, {transform_indices = @transform_5, window_bounds = array<i64: 1, 16, 1>}]} {
    %c0 = arith.constant 0 : index
    %c0_0 = arith.constant 0 : index
    %0 = vector.load %arg4[%c0, %c0_0] : memref<128x768xbf16, #tpu.memory_space<vmem>>, vector<128x128xbf16>
    %c0_1 = arith.constant 0 : index
    %c128 = arith.constant 128 : index
    %1 = vector.load %arg4[%c0_1, %c128] : memref<128x768xbf16, #tpu.memory_space<vmem>>, vector<128x128xbf16>
    %c0_2 = arith.constant 0 : index
    %c256 = arith.constant 256 : index
    %2 = vector.load %arg4[%c0_2, %c256] : memref<128x768xbf16, #tpu.memory_space<vmem>>, vector<128x256xbf16>
    %c0_3 = arith.constant 0 : index
    %c512 = arith.constant 512 : index
    %3 = vector.load %arg4[%c0_3, %c512] : memref<128x768xbf16, #tpu.memory_space<vmem>>, vector<128x256xbf16>
    %c0_4 = arith.constant 0 : index
    %c0_5 = arith.constant 0 : index
    %4 = vector.load %arg5[%c0_4, %c0_5] : memref<8x128xf32, #tpu.memory_space<vmem>>, vector<8x128xf32>
    %5 = vector.extract_strided_slice %4 {offsets = [0, 0], sizes = [1, 128], strides = [1, 1]} : vector<8x128xf32> to vector<1x128xf32>
    %6 = vector.extract_strided_slice %4 {offsets = [1, 0], sizes = [1, 128], strides = [1, 1]} : vector<8x128xf32> to vector<1x128xf32>
    %7 = vector.extract_strided_slice %4 {offsets = [2, 0], sizes = [1, 128], strides = [1, 1]} : vector<8x128xf32> to vector<1x128xf32>
    %8 = vector.extract_strided_slice %4 {offsets = [3, 0], sizes = [1, 128], strides = [1, 1]} : vector<8x128xf32> to vector<1x128xf32>
    %9 = vector.extract_strided_slice %4 {offsets = [4, 0], sizes = [1, 128], strides = [1, 1]} : vector<8x128xf32> to vector<1x128xf32>
    %10 = vector.extract_strided_slice %4 {offsets = [5, 0], sizes = [1, 128], strides = [1, 1]} : vector<8x128xf32> to vector<1x128xf32>
    %11 = vector.extract_strided_slice %4 {offsets = [6, 0], sizes = [1, 1], strides = [1, 1]} : vector<8x128xf32> to vector<1x1xf32>
    %12 = vector.extract_strided_slice %4 {offsets = [6, 1], sizes = [1, 1], strides = [1, 1]} : vector<8x128xf32> to vector<1x1xf32>
    %c0_6 = arith.constant 0 : index
    %c0_7 = arith.constant 0 : index
    %c0_8 = arith.constant 0 : index
    %13 = vector.load %arg1[%c0_6, %c0_7, %c0_8] : memref<1x128x128xbf16, #tpu.memory_space<vmem>>, vector<1x128x128xbf16>
    %14 = vector.shape_cast %13 : vector<1x128x128xbf16> to vector<128x128xbf16>
    %c0_9 = arith.constant 0 : index
    %c0_10 = arith.constant 0 : index
    %c0_11 = arith.constant 0 : index
    %15 = vector.load %arg2[%c0_9, %c0_10, %c0_11] : memref<1x128x128xbf16, #tpu.memory_space<vmem>>, vector<1x128x128xbf16>
    %16 = vector.shape_cast %15 : vector<1x128x128xbf16> to vector<128x128xbf16>
    %cst = arith.constant dense<0.000000e+00> : vector<128x128xf32>
    %17 = tpu.matmul %14, %16, %cst {dimension_numbers = #tpu.dot_dimension_numbers<[1], [0], [0], [1], [0, 0, 1, 1], [], []>} : vector<128x128xbf16>, vector<128x128xbf16>, vector<128x128xf32> -> vector<128x128xf32>
    %18 = arith.truncf %17 : vector<128x128xf32> to vector<128x128xbf16>
    %cst_12 = arith.constant dense<0.000000e+00> : vector<128x128xf32>
    %19 = tpu.matmul %18, %0, %cst_12 {dimension_numbers = #tpu.dot_dimension_numbers<[1], [0], [0], [1], [0, 0, 1, 1], [], []>} : vector<128x128xbf16>, vector<128x128xbf16>, vector<128x128xf32> -> vector<128x128xf32>
    %20 = vector.broadcast %5 : vector<1x128xf32> to vector<128x128xf32>
    %21 = arith.addf %19, %20 : vector<128x128xf32>
    %cst_13 = arith.constant 0.000000e+00 : f32
    %22 = vector.broadcast %cst_13 : f32 to vector<128x128xf32>
    %23 = arith.maximumf %21, %22 : vector<128x128xf32>
    %24 = arith.truncf %23 : vector<128x128xf32> to vector<128x128xbf16>
    %cst_14 = arith.constant dense<0.000000e+00> : vector<128x128xf32>
    %25 = tpu.matmul %14, %24, %cst_14 {dimension_numbers = #tpu.dot_dimension_numbers<[1], [0], [0], [1], [0, 0, 1, 1], [], []>} : vector<128x128xbf16>, vector<128x128xbf16>, vector<128x128xf32> -> vector<128x128xf32>
    %26 = arith.truncf %25 : vector<128x128xf32> to vector<128x128xbf16>
    %cst_15 = arith.constant dense<0.000000e+00> : vector<128x128xf32>
    %27 = tpu.matmul %26, %1, %cst_15 {dimension_numbers = #tpu.dot_dimension_numbers<[1], [0], [0], [1], [0, 0, 1, 1], [], []>} : vector<128x128xbf16>, vector<128x128xbf16>, vector<128x128xf32> -> vector<128x128xf32>
    %28 = vector.broadcast %6 : vector<1x128xf32> to vector<128x128xf32>
    %29 = arith.addf %27, %28 : vector<128x128xf32>
    %cst_16 = arith.constant 0.000000e+00 : f32
    %30 = vector.broadcast %cst_16 : f32 to vector<128x128xf32>
    %31 = arith.maximumf %29, %30 : vector<128x128xf32>
    %32 = arith.truncf %31 : vector<128x128xf32> to vector<128x128xbf16>
    %33 = tpu.iota {dimensions = array<i32: 1>} : vector<16x128xi32>
    %34 = tpu.iota {dimensions = array<i32: 0>} : vector<16x128xi32>
    %c0_17 = arith.constant 0 : index
    %c0_18 = arith.constant 0 : index
    %c0_19 = arith.constant 0 : index
    %35 = vector.load %arg3[%c0_17, %c0_18, %c0_19] : memref<1x16x1xi32, #tpu.memory_space<vmem>>, vector<1x16x1xi32>
    %36 = vector.shape_cast %35 : vector<1x16x1xi32> to vector<16x1xi32>
    %37 = vector.broadcast %36 : vector<16x1xi32> to vector<16x128xi32>
    %38 = arith.cmpi eq, %33, %37 : vector<16x128xi32>
    %39 = arith.extui %38 : vector<16x128xi1> to vector<16x128xi32>
    %40 = arith.sitofp %39 : vector<16x128xi32> to vector<16x128xf32>
    %c9_i32 = arith.constant 9 : i32
    %41 = vector.broadcast %c9_i32 : i32 to vector<16x128xi32>
    %42 = arith.cmpi eq, %34, %41 : vector<16x128xi32>
    %c8_i32 = arith.constant 8 : i32
    %43 = vector.broadcast %c8_i32 : i32 to vector<16x128xi32>
    %44 = arith.cmpi slt, %33, %43 : vector<16x128xi32>
    %45 = arith.andi %42, %44 : vector<16x128xi1>
    %cst_20 = arith.constant 1.250000e-01 : f32
    %cst_21 = arith.constant 0.000000e+00 : f32
    %46 = vector.broadcast %cst_20 : f32 to vector<16x128xf32>
    %47 = vector.broadcast %cst_21 : f32 to vector<16x128xf32>
    %48 = arith.select %45, %46, %47 : vector<16x128xi1>, vector<16x128xf32>
    %49 = arith.addf %40, %48 : vector<16x128xf32>
    %c10_i32 = arith.constant 10 : i32
    %50 = vector.broadcast %c10_i32 : i32 to vector<16x128xi32>
    %51 = arith.cmpi eq, %34, %50 : vector<16x128xi32>
    %c8_i32_22 = arith.constant 8 : i32
    %52 = vector.broadcast %c8_i32_22 : i32 to vector<16x128xi32>
    %53 = arith.cmpi sge, %33, %52 : vector<16x128xi32>
    %54 = arith.andi %51, %53 : vector<16x128xi1>
    %c24_i32 = arith.constant 24 : i32
    %55 = vector.broadcast %c24_i32 : i32 to vector<16x128xi32>
    %56 = arith.cmpi slt, %33, %55 : vector<16x128xi32>
    %57 = arith.andi %54, %56 : vector<16x128xi1>
    %cst_23 = arith.constant 6.250000e-02 : f32
    %cst_24 = arith.constant 0.000000e+00 : f32
    %58 = vector.broadcast %cst_23 : f32 to vector<16x128xf32>
    %59 = vector.broadcast %cst_24 : f32 to vector<16x128xf32>
    %60 = arith.select %57, %58, %59 : vector<16x128xi1>, vector<16x128xf32>
    %61 = arith.addf %49, %60 : vector<16x128xf32>
    %62 = arith.truncf %61 : vector<16x128xf32> to vector<16x128xbf16>
    %cst_25 = arith.constant dense<0.000000e+00> : vector<16x128xf32>
    %63 = tpu.matmul %62, %32, %cst_25 {dimension_numbers = #tpu.dot_dimension_numbers<[1], [0], [0], [1], [0, 0, 1, 1], [], []>} : vector<16x128xbf16>, vector<128x128xbf16>, vector<16x128xf32> -> vector<16x128xf32>
    %64 = arith.truncf %63 : vector<16x128xf32> to vector<16x128xbf16>
    %cst_26 = arith.constant dense<0.000000e+00> : vector<16x256xf32>
    %65 = tpu.matmul %64, %2, %cst_26 {dimension_numbers = #tpu.dot_dimension_numbers<[1], [0], [0], [1], [0, 0, 1, 1], [], []>} : vector<16x128xbf16>, vector<128x256xbf16>, vector<16x256xf32> -> vector<16x256xf32>
    %cst_27 = arith.constant dense<0.000000e+00> : vector<16x256xf32>
    %66 = tpu.matmul %64, %3, %cst_27 {dimension_numbers = #tpu.dot_dimension_numbers<[1], [0], [0], [1], [0, 0, 1, 1], [], []>} : vector<16x128xbf16>, vector<128x256xbf16>, vector<16x256xf32> -> vector<16x256xf32>
    %67 = vector.extract_strided_slice %66 {offsets = [0, 0], sizes = [16, 128], strides = [1, 1]} : vector<16x256xf32> to vector<16x128xf32>
    %68 = vector.extract_strided_slice %65 {offsets = [8, 0], sizes = [1, 128], strides = [1, 1]} : vector<16x256xf32> to vector<1x128xf32>
    %69 = vector.broadcast %68 : vector<1x128xf32> to vector<16x128xf32>
    %70 = arith.addf %67, %69 : vector<16x128xf32>
    %71 = vector.broadcast %7 : vector<1x128xf32> to vector<16x128xf32>
    %72 = arith.addf %70, %71 : vector<16x128xf32>
    %cst_28 = arith.constant 0.000000e+00 : f32
    %73 = vector.broadcast %cst_28 : f32 to vector<16x128xf32>
    %74 = arith.maximumf %72, %73 : vector<16x128xf32>
    %75 = vector.extract_strided_slice %65 {offsets = [9, 128], sizes = [1, 128], strides = [1, 1]} : vector<16x256xf32> to vector<1x128xf32>
    %76 = vector.extract_strided_slice %66 {offsets = [10, 128], sizes = [1, 128], strides = [1, 1]} : vector<16x256xf32> to vector<1x128xf32>
    %77 = arith.addf %75, %76 : vector<1x128xf32>
    %78 = arith.addf %77, %8 : vector<1x128xf32>
    %cst_29 = arith.constant 0.000000e+00 : f32
    %79 = vector.broadcast %cst_29 : f32 to vector<1x128xf32>
    %80 = arith.maximumf %78, %79 : vector<1x128xf32>
    %81 = tpu.iota {dimensions = array<i32: 0>} : vector<16x1xi32>
    %c8_i32_30 = arith.constant 8 : i32
    %82 = vector.broadcast %c8_i32_30 : i32 to vector<16x1xi32>
    %83 = arith.cmpi slt, %81, %82 : vector<16x1xi32>
    %84 = vector.shape_cast %83 : vector<16x1xi1> to vector<16x1xi1>
    %85 = vector.broadcast %84 : vector<16x1xi1> to vector<16x128xi1>
    %86 = vector.shape_cast %80 : vector<1x128xf32> to vector<1x128xf32>
    %87 = vector.broadcast %86 : vector<1x128xf32> to vector<16x128xf32>
    %88 = arith.select %85, %74, %87 : vector<16x128xi1>, vector<16x128xf32>
    %89 = vector.shape_cast %83 : vector<16x1xi1> to vector<16x1xi1>
    %90 = vector.broadcast %89 : vector<16x1xi1> to vector<16x128xi1>
    %91 = vector.shape_cast %9 : vector<1x128xf32> to vector<1x128xf32>
    %92 = vector.broadcast %91 : vector<1x128xf32> to vector<16x128xf32>
    %93 = vector.shape_cast %10 : vector<1x128xf32> to vector<1x128xf32>
    %94 = vector.broadcast %93 : vector<1x128xf32> to vector<16x128xf32>
    %95 = arith.select %90, %92, %94 : vector<16x128xi1>, vector<16x128xf32>
    %c8_i32_31 = arith.constant 8 : i32
    %96 = vector.broadcast %c8_i32_31 : i32 to vector<16x1xi32>
    %97 = arith.cmpi eq, %81, %96 : vector<16x1xi32>
    %cst_32 = arith.constant 0.000000e+00 : f32
    %98 = vector.shape_cast %12 : vector<1x1xf32> to vector<1x1xf32>
    %99 = vector.broadcast %98 : vector<1x1xf32> to vector<16x1xf32>
    %100 = vector.broadcast %cst_32 : f32 to vector<16x1xf32>
    %101 = arith.select %97, %99, %100 : vector<16x1xi1>, vector<16x1xf32>
    %102 = vector.shape_cast %11 : vector<1x1xf32> to vector<1x1xf32>
    %103 = vector.broadcast %102 : vector<1x1xf32> to vector<16x1xf32>
    %104 = arith.select %83, %103, %101 : vector<16x1xi1>, vector<16x1xf32>
    %105 = arith.mulf %88, %95 : vector<16x128xf32>
    %cst_33 = arith.constant dense<0.000000e+00> : vector<16xf32>
    %106 = vector.multi_reduction <add>, %105, %cst_33 [1] : vector<16x128xf32> to vector<16xf32>
    %107 = vector.shape_cast %106 : vector<16xf32> to vector<16x1xf32>
    %108 = arith.addf %107, %104 : vector<16x1xf32>
    %c8_i32_34 = arith.constant 8 : i32
    %109 = vector.broadcast %c8_i32_34 : i32 to vector<16x1xi32>
    %110 = arith.cmpi sle, %81, %109 : vector<16x1xi32>
    %cst_35 = arith.constant 0.000000e+00 : f32
    %111 = vector.broadcast %cst_35 : f32 to vector<16x1xf32>
    %112 = arith.select %110, %108, %111 : vector<16x1xi1>, vector<16x1xf32>
    %c0_36 = arith.constant 0 : index
    %c0_37 = arith.constant 0 : index
    %c0_38 = arith.constant 0 : index
    %113 = vector.load %arg6[%c0_36, %c0_37, %c0_38] : memref<1x16x1xf32, #tpu.memory_space<vmem>>, vector<1x16x1xf32>
    %114 = vector.shape_cast %113 : vector<1x16x1xf32> to vector<16x1xf32>
    %115 = vector.shape_cast %112 : vector<16x1xf32> to vector<1x16x1xf32>
    tpu.vector_store %arg6[%c0_36, %c0_37, %c0_38], %115 {strides = array<i32>} : memref<1x16x1xf32, #tpu.memory_space<vmem>>, vector<1x16x1xf32>,
    return
  }
  func.func @transform_0(%arg0: i32) -> (i32, i32, i32) {
    %c0_i32 = arith.constant 0 : i32
    %c0_i32_0 = arith.constant 0 : i32
    %c0_i32_1 = arith.constant 0 : i32
    return %arg0, %c0_i32, %c0_i32_0 : i32, i32, i32
  }
  func.func @transform_1(%arg0: i32) -> (i32, i32, i32) {
    %c0_i32 = arith.constant 0 : i32
    %c0_i32_0 = arith.constant 0 : i32
    %c0_i32_1 = arith.constant 0 : i32
    return %arg0, %c0_i32, %c0_i32_0 : i32, i32, i32
  }
  func.func @transform_2(%arg0: i32) -> (i32, i32, i32) {
    %c0_i32 = arith.constant 0 : i32
    %c0_i32_0 = arith.constant 0 : i32
    %c0_i32_1 = arith.constant 0 : i32
    return %arg0, %c0_i32, %c0_i32_0 : i32, i32, i32
  }
  func.func @transform_3(%arg0: i32) -> (i32, i32) {
    %c0_i32 = arith.constant 0 : i32
    %c0_i32_0 = arith.constant 0 : i32
    %c0_i32_1 = arith.constant 0 : i32
    return %c0_i32, %c0_i32_0 : i32, i32
  }
  func.func @transform_4(%arg0: i32) -> (i32, i32) {
    %c0_i32 = arith.constant 0 : i32
    %c0_i32_0 = arith.constant 0 : i32
    %c0_i32_1 = arith.constant 0 : i32
    return %c0_i32, %c0_i32_0 : i32, i32
  }
  func.func @transform_5(%arg0: i32) -> (i32, i32, i32) {
    %c0_i32 = arith.constant 0 : i32
    %c0_i32_0 = arith.constant 0 : i32
    %c0_i32_1 = arith.constant 0 : i32
    return %arg0, %c0_i32, %c0_i32_0 : i32, i32, i32
  }
}

</mosaic_0001>

<bundles_post_ra>
// kernel: tpu_custom_call.1
= control target key start
LH: loop header
LB: loop body
LE: loop exit
PB: predicated region body
PF: predicated region fallthrough
CT: control target
= control target key end

     0   :  { %10 = vsyncpa [#allocation3], 0  ;;  %s1878_s0 = inlined_call_operand.hbm [shape: bf16[1,128,128], index: 0, kind: input, shape index: {}]   ;;  %s1879_s1 = inlined_call_operand.hbm [shape: bf16[1,128,128], index: 1, kind: input, shape index: {}]   ;;  %s1880_s2 = inlined_call_operand.vmem [shape: s32[1,16,1], index: 2, kind: input, shape index: {}]   ;;  %s1881_s3 = inlined_call_operand.hbm [shape: bf16[128,768], index: 3, kind: input, shape index: {}]   ;;  %s1882_s4 = inlined_call_operand.vmem [shape: f32[8,128], index: 4, kind: input, shape index: {}]   ;;  %s1883_s5 = inlined_call_operand.vmem [shape: f32[1,16,1], index: 5, kind: output, shape index: {}]  }
   0x1   :  { %11 = vsyncpa [#allocation5], 0  ;;  %s1675_s18 = smov [#allocation4]   ;;  %s1676_s20 = smov [#allocation2]  }
   0x2   :  { %s29_s19 = sshll.u32 %s1675_s18, 4  ;;  %s17_s21 = sshll.u32 %s1676_s20, 4  ;;  %s30_s19 = int_to_ptr.vmem [resolvable:$true] %s29_s19  ;;  %s1718_s21 = int_to_ptr.vmem [resolvable:$true] %s17_s21 }
   0x3   :  { %s1605_s24 = scalar_lea.hbm %s1879_s1, 1024 }
   0x4   :  { %p1606_p0 = scmp.ne.s32.totalorder %s1879_s1, %s1605_s24  ;;  %p1609_p1 = scmp.lt.u32.totalorder %s1605_s24, %s1879_s1 }
   0x6   :  { %p1611_p2 = pnand %p1609_p1, %p1606_p0 }
   0x8   :  { %1614 = shalt.err (!%p1611_p2)
}
   0x9   :  { %s1615_s29 = scalar_lea.vmem %s30_s19, 1024  ;;  %p1620_p4 = scmp.lt.s32.totalorder %s30_s19, %s30_s19 }
   0xa   :  { %p1616_p3 = scmp.ne.s32.totalorder %s30_s19, %s1615_s29  ;;  %p1621_p5 = scmp.lt.s32.totalorder %s1615_s29, %s1615_s29 }
   0xc   :  { %p1622_p6 = por %p1621_p5, %p1620_p4 }
   0xe   :  { %p1623_p7 = pnand %p1622_p6, %p1616_p3 }
  0x10   :  { %1626 = shalt.err (!%p1623_p7)
}
  0x11   :  { %s1677_s30 = smov 64   ;;  %s1678_s6 = smov 4  }
  0x12   :  { %35 = dma.hbm_to_vmem [thread:$0]  %s1879_s1, 1024, %s30_s19, [#allocation5], %s1677_s30, %s1677_s30, %s1678_s6  }
  0x13   :  { %s1627_s11 = scalar_lea.hbm %s1878_s0, 1024 }
  0x14   :  { %p1628_p8 = scmp.ne.s32.totalorder %s1878_s0, %s1627_s11  ;;  %p1631_p9 = scmp.lt.u32.totalorder %s1627_s11, %s1878_s0 }
  0x16   :  { %p1633_p10 = pnand %p1631_p9, %p1628_p8 }
  0x18   :  { %1636 = shalt.err (!%p1633_p10)
}
  0x19   :  { %s1637_s16 = scalar_lea.vmem %s1718_s21, 1024  ;;  %p1642_p12 = scmp.lt.s32.totalorder %s1718_s21, %s1718_s21 }
  0x1a   :  { %p1638_p11 = scmp.ne.s32.totalorder %s1718_s21, %s1637_s16  ;;  %p1643_p13 = scmp.lt.s32.totalorder %s1637_s16, %s1637_s16 }
  0x1c   :  { %p1644_p0 = por %p1643_p13, %p1642_p12 }
  0x1e   :  { %p1645_p1 = pnand %p1644_p0, %p1638_p11 }
  0x20   :  { %1648 = shalt.err (!%p1645_p1)
}
  0x21   :  { %23 = dma.hbm_to_vmem [thread:$0]  %s1878_s0, 1024, %s1718_s21, [#allocation3], %s1677_s30, %s1677_s30, %s1678_s6  }
  0x22   :  { %s1679_s18 = smov [#allocation6]   ;;  %s1649_s23 = scalar_lea.hbm %s1881_s3, 6144 }
  0x23   :  { %s43_s19 = sshll.u32 %s1679_s18, 4  ;;  %p1650_p2 = scmp.ne.s32.totalorder %s1881_s3, %s1649_s23  ;;  %s44_s19 = int_to_ptr.vmem [resolvable:$true] %s43_s19 }
  0x24   :  { %p1653_p3 = scmp.lt.u32.totalorder %s1649_s23, %s1881_s3 }
  0x26   :  { %p1655_p4 = pnand %p1653_p3, %p1650_p2 }
  0x28   :  { %1658 = shalt.err (!%p1655_p4)
}
  0x29   :  { %s1659_s28 = scalar_lea.vmem %s44_s19, 6144  ;;  %p1664_p6 = scmp.lt.s32.totalorder %s44_s19, %s44_s19 }
  0x2a   :  { %p1660_p5 = scmp.ne.s32.totalorder %s44_s19, %s1659_s28  ;;  %p1665_p7 = scmp.lt.s32.totalorder %s1659_s28, %s1659_s28 }
  0x2c   :  { %p1666_p8 = por %p1665_p7, %p1664_p6 }
  0x2e   :  { %p1667_p9 = pnand %p1666_p8, %p1660_p5 }
  0x30   :  { %1670 = shalt.err (!%p1667_p9)
}
  0x31   :  { %s1680_s0 = smov 384   ;;  %s1681_s21 = smov 24  }
  0x32   :  { %49 = dma.hbm_to_vmem [thread:$0]  %s1881_s3, 6144, %s44_s19, [#allocation5], %s1680_s0, %s1680_s0, %s1681_s21  }
  0x33   :  { %1671 = dma.done.wait [#allocation3], 1024  }
  0x34   :  { %1672 = vsyncadd [#allocation3], 4294966272 }
  0x35   :  { %1673 = dma.done.wait [#allocation5], 7168  }
  0x36   :  { %1674 = vsyncadd [#allocation5], 4294960128  ;;  %v1525_v0 = vld [vmem:[#allocation4] sm:$0xff]   ;;  %v1526_v1 = vld [vmem:[#allocation4 + $0x8] sm:$0xff]   ;;  %v360_v55 = vlaneseq  ;;  %vm1684_vm0 = vmmov 0   ;;  %vm1686_vm11 = vmmov 1  }
  0x37   :  { %1363 = vmatprep.subr.bf16.mxu0 %v1525_v0  ;;  %v1527_v2 = vld [vmem:[#allocation4 + $0x10] sm:$0xff]   ;;  %v1528_v3 = vld [vmem:[#allocation4 + $0x18] sm:$0xff]   ;;  %v1533_v4 = vld [vmem:[#allocation2] sm:$0xff]   ;;  %vm1212_vm15 = vcmask 7168  }
  0x38   :  { %1364 = vmatpush3.bf16.msra.mxu0 %v1525_v0  ;;  %1379 = vmatprep.mubr.bf16.mxu0 %v1533_v4  ;;  %v1529_v5 = vld [vmem:[#allocation4 + $0x20] sm:$0xff]   ;;  %v1530_v6 = vld [vmem:[#allocation4 + $0x28] sm:$0xff]   ;;  %v1531_v9 = vld [vmem:[#allocation4 + $0x30] sm:$0xff]   ;;  %v1783_v56 = vshrl.u32 %v360_v55, 7 }
  0x39   :  { %1365 = vmatprep.subr.bf16.mxu0 %v1526_v1  ;;  %v1541_v7 = vld [vmem:[#allocation6] ss:$24 sps:$4 sm:$0xff]   ;;  %v1542_v8 = vld [vmem:[#allocation6 + $0x30] ss:$24 sps:$4 sm:$0xff]   ;;  %v1549_v48 = vld [vmem:[#allocation6 + $0x4] ss:$24 sps:$4 sm:$0xff]  }
  0x3a   :  { %1395 = vmatprep.subr.bf16.mxu1 %v1541_v7  ;;  %v1543_v10 = vld [vmem:[#allocation6 + $0x60] ss:$24 sps:$4 sm:$0xff]   ;;  %v1544_v12 = vld [vmem:[#allocation6 + $0x90] ss:$24 sps:$4 sm:$0xff]   ;;  %v1550_v49 = vld [vmem:[#allocation6 + $0x34] ss:$24 sps:$4 sm:$0xff]  }
  0x3b   :  { %1396 = vmatpush3.bf16.msra.mxu1 %v1541_v7  ;;  %v1532_v11 = vld [vmem:[#allocation4 + $0x38] sm:$0xff]   ;;  %v1761_v14 = vld [vmem:[#allocation2 + $0x8] sm:$0xff]   ;;  %v1763_v15 = vld [vmem:[#allocation2 + $0x10] sm:$0xff]   ;;  %v362_v57 = vsub.s32 0, %v1783_v56 }
  0x3c   :  { %1366 = vmatpush3.bf16.msra.mxu0 %v1526_v1  ;;  %1397 = vmatprep.subr.bf16.mxu1 %v1542_v8  ;;  %v1545_v13 = vld [vmem:[#allocation6 + $0xc0] ss:$24 sps:$4 sm:$0xff]   ;;  %v1546_v16 = vld [vmem:[#allocation6 + $0xf0] ss:$24 sps:$4 sm:$0xff]   ;;  %v1551_v50 = vld [vmem:[#allocation6 + $0x64] ss:$24 sps:$4 sm:$0xff]  }
  0x3d   :  { %1367 = vmatprep.subr.bf16.mxu0 %v1527_v2  ;;  %v1547_v17 = vld [vmem:[#allocation6 + $0x120] ss:$24 sps:$4 sm:$0xff]   ;;  %v1773_v20 = vld [vmem:[#allocation2 + $0x28] sm:$0xff]   ;;  %v1775_v21 = vld [vmem:[#allocation2 + $0x30] sm:$0xff]  }
  0x3e   :  { %v1767_v18 = vld [vmem:[#allocation2 + $0x18] sm:$0xff]   ;;  %v1769_v19 = vld [vmem:[#allocation2 + $0x20] sm:$0xff]   ;;  %v1548_v23 = vld [vmem:[#allocation6 + $0x150] ss:$24 sps:$4 sm:$0xff]  }
  0x3f   :  { %1398 = vmatpush3.bf16.msra.mxu1 %v1542_v8  ;;  %v1779_v22 = vld [vmem:[#allocation2 + $0x38] sm:$0xff]   ;;  %v1552_v51 = vld [vmem:[#allocation6 + $0x94] ss:$24 sps:$4 sm:$0xff]   ;;  %v1789_v58 = vld [vmem:[%s1882_s4] sm:$0xff] }
  0x40   :  { %1368 = vmatpush3.bf16.msra.mxu0 %v1527_v2  ;;  %1399 = vmatprep.subr.bf16.mxu1 %v1543_v10  ;;  %v1553_v52 = vld [vmem:[#allocation6 + $0xc4] ss:$24 sps:$4 sm:$0xff]   ;;  %v1554_v53 = vld [vmem:[#allocation6 + $0xf4] ss:$24 sps:$4 sm:$0xff]   ;;  %v363_v59 = vrot.slane %v1789_v58, %v362_v57 }
  0x41   :  { %1369 = vmatprep.subr.bf16.mxu0 %v1528_v3  ;;  %v1555_v54 = vld [vmem:[#allocation6 + $0x124] ss:$24 sps:$4 sm:$0xff]  }
  0x43   :  { %1400 = vmatpush3.bf16.msra.mxu1 %v1543_v10 }
  0x44   :  { %1370 = vmatpush3.bf16.msra.mxu0 %v1528_v3  ;;  %1401 = vmatprep.subr.bf16.mxu1 %v1544_v12 }
  0x45   :  { %1371 = vmatprep.subr.bf16.mxu0 %v1529_v5 }
  0x47   :  { %1402 = vmatpush3.bf16.msra.mxu1 %v1544_v12 }
  0x48   :  { %1372 = vmatpush3.bf16.msra.mxu0 %v1529_v5  ;;  %1403 = vmatprep.subr.bf16.mxu1 %v1545_v13 }
  0x49   :  { %1373 = vmatprep.subr.bf16.mxu0 %v1530_v6 }
  0x4b   :  { %1404 = vmatpush3.bf16.msra.mxu1 %v1545_v13 }
  0x4c   :  { %1374 = vmatpush3.bf16.msra.mxu0 %v1530_v6  ;;  %1405 = vmatprep.subr.bf16.mxu1 %v1546_v16 }
  0x4d   :  { %1375 = vmatprep.subr.bf16.mxu0 %v1531_v9 }
  0x4f   :  { %1406 = vmatpush3.bf16.msra.mxu1 %v1546_v16 }
  0x50   :  { %1376 = vmatpush3.bf16.msra.mxu0 %v1531_v9  ;;  %1407 = vmatprep.subr.bf16.mxu1 %v1547_v17 }
  0x51   :  { %1377 = vmatprep.subr.bf16.mxu0 %v1532_v11 }
  0x53   :  { %1408 = vmatpush3.bf16.msra.mxu1 %v1547_v17 }
  0x54   :  { %1378 = vmatpush3.bf16.msra.mxu0 %v1532_v11  ;;  %1409 = vmatprep.subr.bf16.mxu1 %v1548_v23 }
  0x57   :  { %1380 = vmatmul.mubr.bf16.vlgmr.msra.gmra.mrb[0].mxu0 %v1761_v14  ;;  %1410 = vmatpush3.bf16.msra.mxu1 %v1548_v23 }
  0x58   :  { %1383 = vmatprep.mubr.bf16.mxu0 %v1763_v15  ;;  %1459 = vmatprep.subr.bf16.mxu1 %v1549_v48 }
  0x5f   :  { %1384 = vmatmul.mubr.bf16.gmra.mrb[4].mxu0 %v1767_v18 }
  0x60   :  { %1387 = vmatprep.mubr.bf16.mxu0 %v1769_v19 }
  0x67   :  { %1388 = vmatmul.mubr.bf16.gmra.mrb[8].mxu0 %v1773_v20 }
  0x68   :  { %1391 = vmatprep.mubr.bf16.mxu0 %v1775_v21 }
  0x6f   :  { %1392 = vmatmul.mubr.bf16.gmra.mrb[12].mxu0 %v1779_v22 }
  0x70   :  { %1443 = vmatprep.mubr.bf16.mxu0 %v1533_v4 }
 0x12a   :  { %v1381_v24 = vpop.f32.mrb[0].mxu0 }
 0x12b   :  { %v289_v25 = vpop.f32.mrb[1].mxu0 }
 0x12c   :  { %v1382_v26 = vpop.f32.mrb[2].mxu0 }
 0x12d   :  { %v353_v27 = vpack.c.bf16 %v1382_v26, %v1381_v24  ;;  %v292_v28 = vpop.f32.mrb[3].mxu0 }
 0x12e   :  { %v352_v29 = vpack.c.bf16 %v292_v28, %v289_v25 }
 0x130   :  { %1411 = vmatprep.mubr.bf16.mxu1 %v352_v29 }
 0x131   :  { %1412 = vmatmul.mubr.bf16.vlgmr.msra.gmra.mrb[0].mxu1 %v353_v27 }
 0x132   :  { %v1385_v30 = vpop.f32.mrb[4].mxu0  ;;  %1460 = vmatpush3.bf16.msra.mxu1 %v1549_v48 }
 0x133   :  { %v305_v31 = vpop.f32.mrb[5].mxu0  ;;  %1461 = vmatprep.subr.bf16.mxu1 %v1550_v49 }
 0x134   :  { %v1386_v32 = vpop.f32.mrb[6].mxu0 }
 0x135   :  { %v355_v33 = vpack.c.bf16 %v1386_v32, %v1385_v30  ;;  %v308_v34 = vpop.f32.mrb[7].mxu0 }
 0x136   :  { %v354_v35 = vpack.c.bf16 %v308_v34, %v305_v31  ;;  %1462 = vmatpush3.bf16.msra.mxu1 %v1550_v49 }
 0x137   :  { %1463 = vmatprep.subr.bf16.mxu1 %v1551_v50 }
 0x138   :  { %1415 = vmatprep.mubr.bf16.mxu1 %v354_v35 }
 0x139   :  { %1416 = vmatmul.mubr.bf16.gmra.mrb[4].mxu1 %v355_v33 }
 0x13a   :  { %v1389_v36 = vpop.f32.mrb[8].mxu0  ;;  %1464 = vmatpush3.bf16.msra.mxu1 %v1551_v50 }
 0x13b   :  { %v321_v37 = vpop.f32.mrb[9].mxu0  ;;  %1465 = vmatprep.subr.bf16.mxu1 %v1552_v51 }
 0x13c   :  { %v1390_v38 = vpop.f32.mrb[10].mxu0 }
 0x13d   :  { %v357_v39 = vpack.c.bf16 %v1390_v38, %v1389_v36  ;;  %v324_v40 = vpop.f32.mrb[11].mxu0 }
 0x13e   :  { %v356_v41 = vpack.c.bf16 %v324_v40, %v321_v37  ;;  %1466 = vmatpush3.bf16.msra.mxu1 %v1552_v51 }
 0x13f   :  { %1467 = vmatprep.subr.bf16.mxu1 %v1553_v52 }
 0x140   :  { %1419 = vmatprep.mubr.bf16.mxu1 %v356_v41 }
 0x141   :  { %1420 = vmatmul.mubr.bf16.gmra.mrb[8].mxu1 %v357_v39 }
 0x142   :  { %v1393_v42 = vpop.f32.mrb[12].mxu0  ;;  %1468 = vmatpush3.bf16.msra.mxu1 %v1553_v52 }
 0x143   :  { %v337_v43 = vpop.f32.mrb[13].mxu0  ;;  %1469 = vmatprep.subr.bf16.mxu1 %v1554_v53 }
 0x144   :  { %v1394_v44 = vpop.f32.mrb[14].mxu0 }
 0x145   :  { %v359_v45 = vpack.c.bf16 %v1394_v44, %v1393_v42  ;;  %v340_v46 = vpop.f32.mrb[15].mxu0 }
 0x146   :  { %v358_v47 = vpack.c.bf16 %v340_v46, %v337_v43  ;;  %1470 = vmatpush3.bf16.msra.mxu1 %v1554_v53 }
 0x147   :  { %1471 = vmatprep.subr.bf16.mxu1 %v1555_v54 }
 0x148   :  { %1423 = vmatprep.mubr.bf16.mxu1 %v358_v47 }
 0x149   :  { %1424 = vmatmul.mubr.bf16.gmra.mrb[12].mxu1 %v359_v45 }
 0x14a   :  { %1472 = vmatpush3.bf16.msra.mxu1 %v1555_v54 }
 0x204   :  { %v1413_v60 = vpop.f32.mrb[0].mxu1 }
 0x205   :  { %v455_v61 = vadd.f32 %v1413_v60, %v363_v59  ;;  %v446_v62 = vpop.f32.mrb[1].mxu1 }
 0x206   :  { %v447_v63 = vadd.f32 %v446_v62, %v363_v59  ;;  %v1414_v0 = vpop.f32.mrb[2].mxu1 }
 0x207   :  { %v458_v1 = vadd.f32 %v1414_v0, %v363_v59  ;;  %v449_v2 = vpop.f32.mrb[3].mxu1  ;;  %v511_v4 = vmax.f32 %v455_v61, 0.0  ;;  %v817_v0 = vld [vmem:[%s1880_s2 + $0x8] sm:$0xff] }
 0x208   :  { %v450_v3 = vadd.f32 %v449_v2, %v363_v59  ;;  %v509_v6 = vmax.f32 %v447_v63, 0.0 }
 0x209   :  { %v512_v5 = vmax.f32 %v458_v1, 0.0 }
 0x20a   :  { %v510_v7 = vmax.f32 %v450_v3, 0.0 }
 0x20b   :  { %v526_v8 = vpack.c.bf16 %v512_v5, %v511_v4 }
 0x20c   :  { %v525_v9 = vpack.c.bf16 %v510_v7, %v509_v6  ;;  %v1417_v10 = vpop.f32.mrb[4].mxu1 }
 0x20d   :  { %v471_v11 = vadd.f32 %v1417_v10, %v363_v59  ;;  %v462_v12 = vpop.f32.mrb[5].mxu1 }
 0x20e   :  { %v463_v13 = vadd.f32 %v462_v12, %v363_v59  ;;  %v1418_v16 = vpop.f32.mrb[6].mxu1  ;;  %1427 = vmatprep.subr.bf16.mxu0 %v525_v9 }
 0x20f   :  { %v474_v17 = vadd.f32 %v1418_v16, %v363_v59  ;;  %v465_v23 = vpop.f32.mrb[7].mxu1  ;;  %1428 = vmatpush3.bf16.msra.mxu0 %v525_v9  ;;  %v515_v25 = vmax.f32 %v471_v11, 0.0 }
 0x210   :  { %v466_v24 = vadd.f32 %v465_v23, %v363_v59  ;;  %1429 = vmatprep.subr.bf16.mxu0 %v526_v8  ;;  %v513_v27 = vmax.f32 %v463_v13, 0.0 }
 0x211   :  { %v516_v26 = vmax.f32 %v474_v17, 0.0 }
 0x212   :  { %v514_v28 = vmax.f32 %v466_v24, 0.0 }
 0x213   :  { %v528_v29 = vpack.c.bf16 %v516_v26, %v515_v25  ;;  %1430 = vmatpush3.bf16.msra.mxu0 %v526_v8 }
 0x214   :  { %v527_v30 = vpack.c.bf16 %v514_v28, %v513_v27  ;;  %v1421_v31 = vpop.f32.mrb[8].mxu1  ;;  %v1683_v27 = vmov 0.0   ;;  %v1557_v28 = vld [vmem:[#allocation6 + $0x8] ss:$24 sps:$4 sm:$0xff]  }
 0x215   :  { %v487_v32 = vadd.f32 %v1421_v31, %v363_v59  ;;  %v478_v33 = vpop.f32.mrb[9].mxu1  ;;  %v1563_v31 = vld [vmem:[#allocation6 + $0x38] ss:$24 sps:$4 sm:$0xff]  }
 0x216   :  { %v479_v34 = vadd.f32 %v478_v33, %v363_v59  ;;  %v1422_v35 = vpop.f32.mrb[10].mxu1  ;;  %1431 = vmatprep.subr.bf16.mxu0 %v527_v30  ;;  %v1569_v33 = vld [vmem:[#allocation6 + $0x68] ss:$24 sps:$4 sm:$0xff]  }
 0x217   :  { %v490_v36 = vadd.f32 %v1422_v35, %v363_v59  ;;  %v481_v37 = vpop.f32.mrb[11].mxu1  ;;  %1432 = vmatpush3.bf16.msra.mxu0 %v527_v30  ;;  %v519_v39 = vmax.f32 %v487_v32, 0.0  ;;  %v1565_v30 = vld [vmem:[#allocation6 + $0x3c] ss:$24 sps:$4 sm:$0xff]   ;;  %v1571_v32 = vld [vmem:[#allocation6 + $0x6c] ss:$24 sps:$4 sm:$0xff]  }
 0x218   :  { %v482_v38 = vadd.f32 %v481_v37, %v363_v59  ;;  %1433 = vmatprep.subr.bf16.mxu0 %v528_v29  ;;  %v517_v41 = vmax.f32 %v479_v34, 0.0  ;;  %v1577_v34 = vld [vmem:[#allocation6 + $0x9c] ss:$24 sps:$4 sm:$0xff]   ;;  %v1575_v35 = vld [vmem:[#allocation6 + $0x98] ss:$24 sps:$4 sm:$0xff]  }
 0x219   :  { %v520_v40 = vmax.f32 %v490_v36, 0.0  ;;  %v1583_v36 = vld [vmem:[#allocation6 + $0xcc] ss:$24 sps:$4 sm:$0xff]   ;;  %v1581_v37 = vld [vmem:[#allocation6 + $0xc8] ss:$24 sps:$4 sm:$0xff]  }
 0x21a   :  { %v518_v42 = vmax.f32 %v482_v38, 0.0  ;;  %v1589_v38 = vld [vmem:[#allocation6 + $0xfc] ss:$24 sps:$4 sm:$0xff]  }
 0x21b   :  { %v530_v43 = vpack.c.bf16 %v520_v40, %v519_v39  ;;  %1434 = vmatpush3.bf16.msra.mxu0 %v528_v29  ;;  %v1559_v29 = vld [vmem:[#allocation6 + $0xc] ss:$24 sps:$4 sm:$0xff]   ;;  %v1587_v39 = vld [vmem:[#allocation6 + $0xf8] ss:$24 sps:$4 sm:$0xff]  }
 0x21c   :  { %v529_v44 = vpack.c.bf16 %v518_v42, %v517_v41  ;;  %v1425_v45 = vpop.f32.mrb[12].mxu1  ;;  %v1595_v40 = vld [vmem:[#allocation6 + $0x12c] ss:$24 sps:$4 sm:$0xff]   ;;  %v1593_v41 = vld [vmem:[#allocation6 + $0x128] ss:$24 sps:$4 sm:$0xff]   ;;  %v640_v42 = vsub.s32 1, %v1783_v56 }
 0x21d   :  { %v503_v46 = vadd.f32 %v1425_v45, %v363_v59  ;;  %v494_v47 = vpop.f32.mrb[13].mxu1 }
 0x21e   :  { %v495_v48 = vadd.f32 %v494_v47, %v363_v59  ;;  %v1426_v49 = vpop.f32.mrb[14].mxu1  ;;  %1435 = vmatprep.subr.bf16.mxu0 %v529_v44 }
 0x21f   :  { %v506_v50 = vadd.f32 %v1426_v49, %v363_v59  ;;  %v497_v51 = vpop.f32.mrb[15].mxu1  ;;  %1436 = vmatpush3.bf16.msra.mxu0 %v529_v44  ;;  %v523_v53 = vmax.f32 %v503_v46, 0.0 }
 0x220   :  { %v498_v52 = vadd.f32 %v497_v51, %v363_v59  ;;  %1437 = vmatprep.subr.bf16.mxu0 %v530_v43  ;;  %v521_v60 = vmax.f32 %v495_v48, 0.0  ;;  %v1556_v59 = vld [vmem:[#allocation6 + $0x154] ss:$24 sps:$4 sm:$0xff]  }
 0x221   :  { %v524_v54 = vmax.f32 %v506_v50, 0.0  ;;  %1473 = vmatprep.subr.bf16.mxu1 %v1556_v59 }
 0x222   :  { %v522_v61 = vmax.f32 %v498_v52, 0.0  ;;  %1474 = vmatpush3.bf16.msra.mxu1 %v1556_v59 }
 0x223   :  { %v532_v62 = vpack.c.bf16 %v524_v54, %v523_v53  ;;  %1438 = vmatpush3.bf16.msra.mxu0 %v530_v43  ;;  %974 = vmatprep.subr.bf16.mxu1 %v1559_v29  ;;  %v1815_v43 = vrot.slane %v1789_v58, %v640_v42 }
 0x224   :  { %v531_v63 = vpack.c.bf16 %v522_v61, %v521_v60 }
 0x226   :  { %1439 = vmatprep.subr.bf16.mxu0 %v531_v63 }
 0x227   :  { %1440 = vmatpush3.bf16.msra.mxu0 %v531_v63 }
 0x228   :  { %1441 = vmatprep.subr.bf16.mxu0 %v532_v62 }
 0x22b   :  { %1442 = vmatpush3.bf16.msra.mxu0 %v532_v62 }
 0x22c   :  { %1491 = vmatprep.subr.bf16.mxu0 %v1683_v27 }
 0x22e   :  { %1444 = vmatmul.mubr.bf16.vlgmr.msra.gmra.mrb[16].mxu0 %v1761_v14  ;;  %v1682_v14 = vmov 0  }
 0x22f   :  { %1447 = vmatprep.mubr.bf16.mxu0 %v1763_v15  ;;  %1524 = vset.pattern.permute.xlu0 %v1682_v14  ;;  %v816_v15 = vld [vmem:[%s1880_s2] sm:$0xff]  ;;  %s1687_s2 = smov 127  }
 0x230   :  { %822 = vperm.xlu0 %1524, %v817_v0  }
 0x234   :  { %819 = vperm.xlu0 %1524, %v816_v15  }
 0x236   :  { %1448 = vmatmul.mubr.bf16.gmra.mrb[20].mxu0 %v1767_v18 }
 0x237   :  { %1451 = vmatprep.mubr.bf16.mxu0 %v1769_v19 }
 0x23e   :  { %1452 = vmatmul.mubr.bf16.gmra.mrb[24].mxu0 %v1773_v20 }
 0x23f   :  { %1455 = vmatprep.mubr.bf16.mxu0 %v1775_v21 }
 0x246   :  { %1456 = vmatmul.mubr.bf16.gmra.mrb[28].mxu0 %v1779_v22 }
 0x247   :  { %1507 = vmatprep.mubr.msk.bf16.mxu0 %vm1684_vm0, %v1683_v27 }
 0x301   :  { %v1445_v18 = vpop.f32.mrb[16].mxu0 }
 0x302   :  { %v567_v19 = vpop.f32.mrb[17].mxu0 }
 0x303   :  { %v1446_v20 = vpop.f32.mrb[18].mxu0 }
 0x304   :  { %v631_v21 = vpack.c.bf16 %v1446_v20, %v1445_v18  ;;  %v570_v22 = vpop.f32.mrb[19].mxu0 }
 0x305   :  { %v630_v1 = vpack.c.bf16 %v570_v22, %v567_v19 }
 0x307   :  { %1475 = vmatprep.mubr.bf16.mxu1 %v630_v1 }
 0x308   :  { %1476 = vmatmul.mubr.bf16.vlgmr.msra.gmra.mrb[16].mxu1 %v631_v21 }
 0x309   :  { %v1449_v2 = vpop.f32.mrb[20].mxu0  ;;  %975 = vmatpush1.bf16.msra.mxu1 %v1557_v28 }
 0x30a   :  { %v583_v3 = vpop.f32.mrb[21].mxu0  ;;  %976 = vmatprep.subr.bf16.mxu1 %v1565_v30 }
 0x30b   :  { %v1450_v4 = vpop.f32.mrb[22].mxu0 }
 0x30c   :  { %v633_v5 = vpack.c.bf16 %v1450_v4, %v1449_v2  ;;  %v586_v6 = vpop.f32.mrb[23].mxu0 }
 0x30d   :  { %v632_v7 = vpack.c.bf16 %v586_v6, %v583_v3  ;;  %977 = vmatpush1.bf16.msra.mxu1 %v1563_v31 }
 0x30e   :  { %978 = vmatprep.subr.bf16.mxu1 %v1571_v32 }
 0x30f   :  { %1479 = vmatprep.mubr.bf16.mxu1 %v632_v7  ;;  %v1828_v7 = vand.u32 127, %v360_v55 }
 0x310   :  { %1480 = vmatmul.mubr.bf16.gmra.mrb[20].mxu1 %v633_v5 }
 0x311   :  { %v1453_v8 = vpop.f32.mrb[24].mxu0  ;;  %979 = vmatpush1.bf16.msra.mxu1 %v1569_v33  ;;  %vm832_vm2 = vcmp.lt.s32.totalorder %v1828_v7, 8  ;;  %vm841_vm4 = vcmp.ge.s32.totalorder %v1828_v7, 8  ;;  %vm844_vm8 = vcmp.lt.s32.totalorder %v1828_v7, 24 }
 0x312   :  { %v599_v9 = vpop.f32.mrb[25].mxu0  ;;  %980 = vmatprep.subr.bf16.mxu1 %v1577_v34 }
 0x313   :  { %v1454_v10 = vpop.f32.mrb[26].mxu0 }
 0x314   :  { %v635_v11 = vpack.c.bf16 %v1454_v10, %v1453_v8  ;;  %v602_v12 = vpop.f32.mrb[27].mxu0  ;;  %v1831_v8 = vadd.s32 8, %v1783_v56 }
 0x315   :  { %v634_v13 = vpack.c.bf16 %v602_v12, %v599_v9  ;;  %981 = vmatpush1.bf16.msra.mxu1 %v1575_v35 }
 0x316   :  { %982 = vmatprep.subr.bf16.mxu1 %v1583_v36  ;;  %vm831_vm1 = vcmp.eq.s32.totalorder %v1831_v8, 9  ;;  %vm840_vm3 = vcmp.eq.s32.totalorder %v1831_v8, 10  ;;  %vm1183_vm13 = vcmp.eq.s32.totalorder %v1831_v8, 8  ;;  %vm1209_vm14 = vcmp.le.s32.totalorder %v1831_v8, 8 }
 0x317   :  { %1483 = vmatprep.mubr.bf16.mxu1 %v634_v13  ;;  %vm834_vm5 = vmand %vm831_vm1, %vm832_vm2 }
 0x318   :  { %1484 = vmatmul.mubr.bf16.gmra.mrb[24].mxu1 %v635_v11  ;;  %vm843_vm7 = vmand %vm840_vm3, %vm841_vm4  ;;  %v836_v35 = vsel %vm834_vm5, 0.125, %v1683_v27 }
 0x319   :  { %v1457_v16 = vpop.f32.mrb[28].mxu0  ;;  %983 = vmatpush1.bf16.msra.mxu1 %v1581_v37  ;;  %vm846_vm9 = vmand %vm843_vm7, %vm844_vm8 }
 0x31a   :  { %v615_v17 = vpop.f32.mrb[29].mxu0  ;;  %984 = vmatprep.subr.bf16.mxu1 %v1589_v38 }
 0x31b   :  { %v1458_v23 = vpop.f32.mrb[30].mxu0 }
 0x31c   :  { %v637_v24 = vpack.c.bf16 %v1458_v23, %v1457_v16  ;;  %v618_v25 = vpop.f32.mrb[31].mxu0 }
 0x31d   :  { %v636_v26 = vpack.c.bf16 %v618_v25, %v615_v17  ;;  %985 = vmatpush1.bf16.msra.mxu1 %v1587_v39 }
 0x31e   :  { %986 = vmatprep.subr.bf16.mxu1 %v1595_v40 }
 0x31f   :  { %1487 = vmatprep.mubr.bf16.mxu1 %v636_v26  ;;  %v823_v26 = vpop.permute.xlu0 %822 }
 0x320   :  { %1488 = vmatmul.mubr.bf16.gmra.mrb[28].mxu1 %v637_v24  ;;  %vm825_vm6 = vcmp.eq.s32.totalorder %v1828_v7, %v823_v26 }
 0x321   :  { %1006 = vmatprep.mubr.bf16.mxu1 %v1682_v14  ;;  %987 = vmatpush1.bf16.msra.mxu1 %v1593_v41  ;;  %v1254_v36 = vsel %vm825_vm6, 1.0, %v1683_v27 }
 0x3db   :  { %v1477_v44 = vpop.f32.mrb[16].mxu1 }
 0x3dc   :  { %v733_v45 = vadd.f32 %v1477_v44, %v1815_v43  ;;  %v724_v46 = vpop.f32.mrb[17].mxu1  ;;  %v838_v44 = vadd.f32 %v1254_v36, %v836_v35 }
 0x3dd   :  { %v725_v47 = vadd.f32 %v724_v46, %v1815_v43  ;;  %v1478_v48 = vpop.f32.mrb[18].mxu1 }
 0x3de   :  { %v736_v49 = vadd.f32 %v1478_v48, %v1815_v43  ;;  %v727_v50 = vpop.f32.mrb[19].mxu1  ;;  %v789_v52 = vmax.f32 %v733_v45, 0.0 }
 0x3df   :  { %v728_v51 = vadd.f32 %v727_v50, %v1815_v43  ;;  %v787_v54 = vmax.f32 %v725_v47, 0.0  ;;  %v848_v47 = vsel %vm846_vm9, 0.0625, %v1683_v27 }
 0x3e0   :  { %v790_v53 = vmax.f32 %v736_v49, 0.0  ;;  %v850_v50 = vadd.f32 %v848_v47, %v838_v44 }
 0x3e1   :  { %v788_v60 = vmax.f32 %v728_v51, 0.0  ;;  %v820_v51 = vpop.permute.xlu0 %819 }
 0x3e2   :  { %v804_v61 = vpack.c.bf16 %v790_v53, %v789_v52  ;;  %v1562_v52 = vld [vmem:[#allocation6 + $0x14] ss:$24 sps:$4 sm:$0xff]   ;;  %v1685_v53 = vmov 1.0   ;;  %vm824_vm10 = vcmp.eq.s32.totalorder %v1828_v7, %v820_v51 }
 0x3e3   :  { %v803_v62 = vpack.c.bf16 %v788_v60, %v787_v54  ;;  %v1481_v63 = vpop.f32.mrb[20].mxu1  ;;  %v1560_v54 = vld [vmem:[#allocation6 + $0x10] ss:$24 sps:$4 sm:$0xff]   ;;  %v1568_v60 = vld [vmem:[#allocation6 + $0x44] ss:$24 sps:$4 sm:$0xff]   ;;  %vm1255_vm12 = vmpackc.low %vm1686_vm11, %vm824_vm10 }
 0x3e4   :  { %v749_v59 = vadd.f32 %v1481_v63, %v1815_v43  ;;  %v740_v0 = vpop.f32.mrb[21].mxu1  ;;  %v1580_v63 = vld [vmem:[#allocation6 + $0xa4] ss:$24 sps:$4 sm:$0xff]  }
 0x3e5   :  { %v741_v15 = vadd.f32 %v740_v0, %v1815_v43  ;;  %v1482_v18 = vpop.f32.mrb[22].mxu1  ;;  %1492 = vmatpush3.bf16.msra.mxu0 %v803_v62  ;;  %v1574_v62 = vld [vmem:[#allocation6 + $0x74] ss:$24 sps:$4 sm:$0xff]  }
 0x3e6   :  { %v752_v19 = vadd.f32 %v1482_v18, %v1815_v43  ;;  %v743_v20 = vpop.f32.mrb[23].mxu1  ;;  %1493 = vmatprep.subr.bf16.mxu0 %v1683_v27  ;;  %v793_v22 = vmax.f32 %v749_v59, 0.0  ;;  %v1578_v59 = vld [vmem:[#allocation6 + $0xa0] ss:$24 sps:$4 sm:$0xff]   ;;  %v1586_v0 = vld [vmem:[#allocation6 + $0xd4] ss:$24 sps:$4 sm:$0xff]  }
 0x3e7   :  { %v744_v21 = vadd.f32 %v743_v20, %v1815_v43  ;;  %v791_v2 = vmax.f32 %v741_v15, 0.0  ;;  %v1584_v15 = vld [vmem:[#allocation6 + $0xd0] ss:$24 sps:$4 sm:$0xff]   ;;  %v1592_v18 = vld [vmem:[#allocation6 + $0x104] ss:$24 sps:$4 sm:$0xff]  }
 0x3e8   :  { %v794_v1 = vmax.f32 %v752_v19, 0.0  ;;  %v1590_v19 = vld [vmem:[#allocation6 + $0x100] ss:$24 sps:$4 sm:$0xff]   ;;  %v1598_v20 = vld [vmem:[#allocation6 + $0x134] ss:$24 sps:$4 sm:$0xff]  }
 0x3e9   :  { %v792_v3 = vmax.f32 %v744_v21, 0.0  ;;  %1494 = vmatpush3.bf16.msra.mxu0 %v804_v61  ;;  %v1566_v61 = vld [vmem:[#allocation6 + $0x40] ss:$24 sps:$4 sm:$0xff]   ;;  %v1601_v21 = vld [vmem:[#allocation6 + $0x15c] ss:$24 sps:$4 sm:$0xff]  }
 0x3ea   :  { %v806_v4 = vpack.c.bf16 %v794_v1, %v793_v22  ;;  %1495 = vmatprep.subr.bf16.mxu0 %v1683_v27  ;;  %v1604_v22 = vld [vmem:[#allocation6 + $0x164] ss:$24 sps:$4 sm:$0xff]   ;;  %v1599_v1 = vld [vmem:[#allocation6 + $0x158] ss:$24 sps:$4 sm:$0xff]   ;;  %988 = vmatprep.subr.bf16.mxu1 %v1601_v21 }
 0x3eb   :  { %v805_v5 = vpack.c.bf16 %v792_v3, %v791_v2  ;;  %v1485_v6 = vpop.f32.mrb[24].mxu1  ;;  %v1602_v2 = vld [vmem:[#allocation6 + $0x160] ss:$24 sps:$4 sm:$0xff]   ;;  %989 = vmatpush1.bf16.msra.mxu1 %v1599_v1 }
 0x3ec   :  { %v765_v9 = vadd.f32 %v1485_v6, %v1815_v43  ;;  %v756_v10 = vpop.f32.mrb[25].mxu1 }
 0x3ed   :  { %v757_v11 = vadd.f32 %v756_v10, %v1815_v43  ;;  %v1486_v12 = vpop.f32.mrb[26].mxu1  ;;  %1496 = vmatpush3.bf16.msra.mxu0 %v805_v5 }
 0x3ee   :  { %v768_v13 = vadd.f32 %v1486_v12, %v1815_v43  ;;  %v759_v16 = vpop.f32.mrb[27].mxu1  ;;  %1497 = vmatprep.subr.bf16.mxu0 %v1683_v27  ;;  %v797_v55 = vmax.f32 %v765_v9, 0.0  ;;  %v1186_v9 = vsub.s32 6, %v1783_v56 }
 0x3ef   :  { %v760_v17 = vadd.f32 %v759_v16, %v1815_v43  ;;  %v795_v24 = vmax.f32 %v757_v11, 0.0 }
 0x3f0   :  { %v798_v23 = vmax.f32 %v768_v13, 0.0  ;;  %v1187_v10 = vrot.slane %v1789_v58, %v1186_v9 }
 0x3f1   :  { %v796_v25 = vmax.f32 %v760_v17, 0.0  ;;  %1498 = vmatpush3.bf16.msra.mxu0 %v806_v4 }
 0x3f2   :  { %v808_v28 = vpack.c.bf16 %v798_v23, %v797_v55  ;;  %1499 = vmatprep.subr.bf16.mxu0 %v1683_v27  ;;  %v1189_v11 = vsel %vm1183_vm13, %v1187_v10, 0.0 }
 0x3f3   :  { %v807_v29 = vpack.c.bf16 %v796_v25, %v795_v24  ;;  %v1489_v30 = vpop.f32.mrb[28].mxu1  ;;  %1194 = vrot.lane.b32.xlu0 %v1189_v11, %s1687_s2  ;;  %v1145_v24 = vsub.s32 2, %v1783_v56 }
 0x3f4   :  { %v781_v31 = vadd.f32 %v1489_v30, %v1815_v43  ;;  %v772_v32 = vpop.f32.mrb[29].mxu1  ;;  %v1156_v30 = vrot.slane %v1789_v58, 2 }
 0x3f5   :  { %v773_v33 = vadd.f32 %v772_v32, %v1815_v43  ;;  %v1490_v34 = vpop.f32.mrb[30].mxu1  ;;  %1500 = vmatpush3.bf16.msra.mxu0 %v807_v29 }
 0x3f6   :  { %v784_v37 = vadd.f32 %v1490_v34, %v1815_v43  ;;  %v775_v38 = vpop.f32.mrb[31].mxu1  ;;  %1501 = vmatprep.subr.bf16.mxu0 %v1683_v27  ;;  %v801_v40 = vmax.f32 %v781_v31, 0.0  ;;  %v1146_v34 = vrot.slane %v1789_v58, %v1145_v24 }
 0x3f7   :  { %v776_v39 = vadd.f32 %v775_v38, %v1815_v43  ;;  %v799_v45 = vmax.f32 %v773_v33, 0.0  ;;  %v1256_v43 = vpack.c.bf16 %v850_v50, %v1685_v53  ;;  %v1178_v33 = vsub.s32 5, %v1783_v56 }
 0x3f8   :  { %v802_v41 = vmax.f32 %v784_v37, 0.0 }
 0x3f9   :  { %v800_v46 = vmax.f32 %v776_v39, 0.0  ;;  %1502 = vmatpush3.bf16.msra.mxu0 %v808_v28  ;;  %v1179_v37 = vrot.slane %v1789_v58, %v1178_v33  ;;  %v1174_v39 = vsub.s32 4, %v1783_v56 }
 0x3fa   :  { %v810_v48 = vpack.c.bf16 %v802_v41, %v801_v40  ;;  %1503 = vmatprep.subr.bf16.mxu0 %v1683_v27 }
 0x3fb   :  { %v809_v49 = vpack.c.bf16 %v800_v46, %v799_v45  ;;  %v1175_v44 = vrot.slane %v1789_v58, %v1174_v39 }
 0x3fd   :  { %1504 = vmatpush3.bf16.msra.mxu0 %v809_v49 }
 0x3fe   :  { %1505 = vmatprep.subr.bf16.mxu0 %v1683_v27  ;;  %v1572_v27 = vld [vmem:[#allocation6 + $0x70] ss:$24 sps:$4 sm:$0xff]  }
 0x401   :  { %1506 = vmatpush3.bf16.msra.mxu0 %v810_v48 }
 0x402   :  { %1095 = vmatprep.subr.bf16.mxu0 %v1562_v52 }
 0x404   :  { %1508 = vmatmul.mubr.msk.bf16.vlgmr.msra.gmra.mrb[32].mxu0 %vm1255_vm12, %v1256_v43 }
 0x405   :  { %1096 = vmatpush1.bf16.msra.mxu0 %v1560_v54  ;;  %1127 = vmatprep.mubr.bf16.mxu0 %v1682_v14  ;;  %v1596_v14 = vld [vmem:[#allocation6 + $0x130] ss:$24 sps:$4 sm:$0xff]  }
 0x406   :  { %1097 = vmatprep.subr.bf16.mxu0 %v1568_v60 }
 0x409   :  { %1098 = vmatpush1.bf16.msra.mxu0 %v1566_v61 }
 0x40a   :  { %1099 = vmatprep.subr.bf16.mxu0 %v1574_v62 }
 0x40d   :  { %1100 = vmatpush1.bf16.msra.mxu0 %v1572_v27 }
 0x40e   :  { %1101 = vmatprep.subr.bf16.mxu0 %v1580_v63 }
 0x411   :  { %1102 = vmatpush1.bf16.msra.mxu0 %v1578_v59 }
 0x412   :  { %1103 = vmatprep.subr.bf16.mxu0 %v1586_v0 }
 0x415   :  { %1104 = vmatpush1.bf16.msra.mxu0 %v1584_v15 }
 0x416   :  { %1105 = vmatprep.subr.bf16.mxu0 %v1592_v18 }
 0x419   :  { %1106 = vmatpush1.bf16.msra.mxu0 %v1590_v19 }
 0x41a   :  { %1107 = vmatprep.subr.bf16.mxu0 %v1598_v20 }
 0x41d   :  { %1108 = vmatpush1.bf16.msra.mxu0 %v1596_v14 }
 0x41e   :  { %1109 = vmatprep.subr.bf16.mxu0 %v1604_v22 }
 0x421   :  { %1110 = vmatpush1.bf16.msra.mxu0 %v1602_v2 }
 0x465   :  { %v1195_v46 = vpop.permute.xlu0 %1194 }
 0x4d7   :  { %v886_v3 = vpop.f32.mrb[32].mxu0 }
 0x4d8   :  { %v1509_v4 = vpop.f32.mrb[33].mxu0 }
 0x4d9   :  { %v889_v5 = vpop.f32.mrb[34].mxu0 }
 0x4da   :  { %v893_v6 = vpack.c.bf16 %v889_v5, %v886_v3  ;;  %v1510_v7 = vpop.f32.mrb[35].mxu0 }
 0x4dc   :  { %1007 = vmatmul.mubr.bf16.vlgmr.msra.gmra.mrb[32].mxu1 %v893_v6  ;;  %1128 = vmatmul.mubr.bf16.vlgmr.msra.gmra.mrb[36].mxu0 %v893_v6 }
 0x5af   :  { %v1008_v12 = vpop.f32.mrb[32].mxu1  ;;  %v1129_v13 = vpop.f32.mrb[36].mxu0 }
 0x5b0   :  { %v1009_v16 = vpop.f32.mrb[33].mxu1  ;;  %v1131_v17 = vpop.f32.mrb[37].mxu0 }
 0x5b1   :  { %v1010_v55 = vpop.f32.mrb[34].mxu1  ;;  %v1132_v23 = vpop.f32.mrb[38].mxu0 }
 0x5b2   :  { %v1140_v25 = vrot.slane %v1010_v55, %v362_v57  ;;  %v1012_v26 = vpop.f32.mrb[35].mxu1  ;;  %v1134_v28 = vpop.f32.mrb[39].mxu0 }
 0x5b3   :  { %v1152_v29 = vrot.slane %v1134_v28, 1 }
 0x5b4   :  { %v1141_v31 = vadd.f32 %v1140_v25, %v1129_v13 }
 0x5b5   :  { %v1154_v32 = vadd.f32 %v1152_v29, %v1012_v26 }
 0x5b6   :  { %v1147_v38 = vadd.f32 %v1146_v34, %v1141_v31 }
 0x5b7   :  { %v1158_v35 = vadd.f32 %v1156_v30, %v1154_v32 }
 0x5b8   :  { %v1149_v41 = vmax.f32 %v1147_v38, 0.0 }
 0x5b9   :  { %v1159_v36 = vmax.f32 %v1158_v35, 0.0 }
 0x5ba   :  { %v1200_v45 = vmul.f32 %v1175_v44, %v1149_v41 }
 0x5bb   :  { %v1169_v57 = vrot.slane %v1159_v36, %v640_v42 }
 0x5bd   :  { %v1201_v40 = vmul.f32 %v1179_v37, %v1169_v57 }
 0x5bf   :  { %1204 = vadd.xlane.f32.xlu1 %v1201_v40 }
 0x5c3   :  { %1202 = vadd.xlane.f32.xlu1 %v1200_v45 }
 0x64c   :  { %v1205_v47 = vpop.xlane.xlu1 %1204 }
 0x64d   :  { %v1207_v48 = vadd.f32 %v1205_v47, %v1195_v46 }
 0x64f   :  { %v1211_v49 = vsel %vm1209_vm14, %v1207_v48, 0.0 }
 0x650   :  { %1214 = vst.msk [vmem:[%s1883_s5 + $0x8] sm:$0xff] %vm1212_vm15, %v1211_v49  ;;  %v1203_v56 = vpop.xlane.xlu1 %1202 }
 0x651   :  { %v1206_v42 = vadd.f32 %v1203_v56, %v1187_v10 }
 0x653   :  { %1213 = vst.msk [vmem:[%s1883_s5] sm:$0xff] %vm1212_vm15, %v1206_v42 }
 0x654   :  { %1219 = vsyncpa [#allocation3], 1 }
 0x655   :  { %1220 = vsyncpa [#allocation5], 1 }

</bundles_post_ra>
